<compile_context>
chip_gen: v7x
topology: tpu7x:2x2x1
jax: 0.10.0
libtpu: 0.0.40
codegen_flags: <defaults>
</compile_context>

<pallas_src>
import functools

import jax
import jax.numpy as jnp
from jax.experimental import pallas as pl
from jax.experimental.pallas import tpu as pltpu

HIDDEN = 16               # fc1 out / LSTM hidden size (fixed by the module)
GATES = 4 * HIDDEN        # fused i|f|g|o gate width (64)
Q_PAD = 128 - 2 * HIDDEN  # fc2 output padded to 96 so [h|c|q] is 128 lanes


def _round_up(n, m):
    return -(-n // m) * m


def _slab_offsets(d_in):
    """Row offsets of each section inside the packed weight slab."""
    r_ih = _round_up(d_in, 8)          # W_ih rows (16)
    r_hh = r_ih + HIDDEN               # W_hh rows (16)
    r_w2 = r_hh + HIDDEN               # fc2 weight rows (16)
    r_b = r_w2 + HIDDEN                # 3 bias rows
    rows = _round_up(r_b + 3, 8)
    return r_ih, r_hh, r_w2, r_b, rows


def _drqn_kernel(x_ref, w_ref, hc0_ref, out_ref, *, seq_len):
    """One batch tile of the DRQN forward.

    x_ref  : (Bt, T*D_in)  flattened observations for this batch tile
    w_ref  : (R, 128)      packed weight slab (see pack_drqn_weights)
    hc0_ref: (Bt, 32)      packed [h0 | c0]
    out_ref: (Bt, 128)     packed [h_n | c_n | q (zero-padded to 96)]
    """
    H = HIDDEN
    d_in = x_ref.shape[1] // seq_len
    r_ih, r_hh, r_w2, r_b, _ = _slab_offsets(d_in)

    # Static, tile-aligned slices of the single weight operand.
    w1t = w_ref[0:d_in, 0:H]                 # (D_in, 16)   fc1 weight^T
    wih = w_ref[r_ih:r_ih + H, 0:GATES]      # (16, 64)     LSTM W_ih^T (i|f|g|o)
    whh = w_ref[r_hh:r_hh + H, 0:GATES]      # (16, 64)     LSTM W_hh^T
    w2t = w_ref[r_w2:r_w2 + H, 0:Q_PAD]      # (16, 96)     fc2 weight^T, zero-padded
    b1 = w_ref[r_b:r_b + 1, 0:H]             # (1, 16)      fc1 bias
    bg = w_ref[r_b + 1:r_b + 2, 0:GATES]     # (1, 64)      b_ih + b_hh fused
    b2 = w_ref[r_b + 2:r_b + 3, 0:Q_PAD]     # (1, 96)      fc2 bias, zero-padded

    x = x_ref[...]
    h = hc0_ref[:, 0:H]
    c = hc0_ref[:, H:2 * H]

    # Hoisted, recurrence-independent input->gate contribution.  Kept entirely
    # in registers (no VMEM scratch); seq_len is a small compile-time constant
    # (the PyTorch forward is only shape-valid for seq == 1).
    xg = []
    for t in range(seq_len):
        x_t = x[:, t * d_in:(t + 1) * d_in]                          # (Bt, D_in)
        h1 = jnp.maximum(
            jnp.dot(x_t, w1t, preferred_element_type=jnp.float32) + b1, 0.0)
        xg.append(jnp.dot(h1, wih, preferred_element_type=jnp.float32) + bg)

    # Serial LSTM recurrence: only h @ W_hh sits on the dependency chain.
    # Gate activations: two whole-64-lane EUP pushes + one tanh(c) per step.
    # TODO(synk): for long rollouts (seq >> 16) spill xg to a VMEM scratch and
    # hold W_hh in MXU staging registers (pltpu.matmul_push_rhs) across steps.
    for t in range(seq_len):
        gates = xg[t] + jnp.dot(h, whh, preferred_element_type=jnp.float32)
        sg = jax.nn.sigmoid(gates)            # (Bt, 64)
        tg = jnp.tanh(gates)                  # (Bt, 64)
        i_g = sg[:, 0:H]
        f_g = sg[:, H:2 * H]
        g_g = tg[:, 2 * H:3 * H]
        o_g = sg[:, 3 * H:4 * H]
        c = f_g * c + i_g * g_g
        h = o_g * jnp.tanh(c)

    # fc2 + ReLU on the final hidden state (== PyTorch out.view(1,-1) for seq==1).
    q_pad = jnp.maximum(
        jnp.dot(h, w2t, preferred_element_type=jnp.float32) + b2, 0.0)   # (Bt, 96)

    # Single lane-dense (Bt, 128) store: [h | c | q_pad].
    out_ref[...] = jnp.concatenate([h, c, q_pad], axis=1)


def init_drqn_params(key, num_inputs, num_outputs):
    """Deterministic synthetic parameters matching the nn.Module shapes."""
    ks = jax.random.split(key, 8)

    def xavier(k, shape):  # nn.init.xavier_uniform on (out, in) weights
        fan_out, fan_in = shape
        bound = (6.0 / (fan_in + fan_out)) ** 0.5
        return jax.random.uniform(k, shape, jnp.float32, -bound, bound)

    def uni(k, shape, bound):
        return jax.random.uniform(k, shape, jnp.float32, -bound, bound)

    lstm_b = 1.0 / (HIDDEN ** 0.5)
    return {
        "fc1_w": xavier(ks[0], (HIDDEN, num_inputs)),          # (16, D_in)
        "fc1_b": uni(ks[1], (HIDDEN,), 1.0 / (num_inputs ** 0.5)),
        "w_ih": uni(ks[2], (4 * HIDDEN, HIDDEN), lstm_b),      # (64, 16)
        "w_hh": uni(ks[3], (4 * HIDDEN, HIDDEN), lstm_b),      # (64, 16)
        "b_ih": uni(ks[4], (4 * HIDDEN,), lstm_b),
        "b_hh": uni(ks[5], (4 * HIDDEN,), lstm_b),
        "fc2_w": xavier(ks[6], (num_outputs, HIDDEN)),         # (num_out, 16)
        "fc2_b": uni(ks[7], (num_outputs,), 1.0 / (HIDDEN ** 0.5)),
    }


def pack_drqn_weights(params):
    """Pack all weights/biases into one lane-dense (R, 128) f32 slab.

    Call ONCE per parameter set (outside the per-step RL loop) so no
    transpose/scatter glue runs on the per-call path.
    """
    d_in = params["fc1_w"].shape[1]
    n_out = params["fc2_w"].shape[0]
    assert n_out <= Q_PAD, "num_outputs must be <= 96 for the packed layout"
    r_ih, r_hh, r_w2, r_b, rows = _slab_offsets(d_in)

    slab = jnp.zeros((rows, 128), jnp.float32)
    slab = slab.at[0:d_in, 0:HIDDEN].set(params["fc1_w"].T)
    slab = slab.at[r_ih:r_ih + HIDDEN, 0:GATES].set(params["w_ih"].T)
    slab = slab.at[r_hh:r_hh + HIDDEN, 0:GATES].set(params["w_hh"].T)
    slab = slab.at[r_w2:r_w2 + HIDDEN, 0:n_out].set(params["fc2_w"].T)
    slab = slab.at[r_b, 0:HIDDEN].set(params["fc1_b"])
    slab = slab.at[r_b + 1, 0:GATES].set(params["b_ih"] + params["b_hh"])
    slab = slab.at[r_b + 2, 0:n_out].set(params["fc2_b"])
    return slab


@functools.partial(jax.jit, static_argnames=("num_outputs", "block_b"))
def drqn_forward(x, weights, num_outputs, hc0=None, block_b=8):
    """Batched DRQN forward.

    x        : (B, T, num_inputs) float32 observations (T == 1 matches PyTorch)
    weights  : packed slab from pack_drqn_weights (precomputed once)
    hc0      : (B, 32) packed [h0 | c0] carried state, or None for zeros
    returns  : (q (B, num_outputs), hc_n (B, 32) ready to feed back as hc0)
    """
    x = x.astype(jnp.float32)
    B, T, d_in = x.shape
    if hc0 is None:
        hc0 = jnp.zeros((B, 2 * HIDDEN), jnp.float32)
    hc0 = hc0.astype(jnp.float32)

    bb = block_b
    if bb % 8 != 0 or B % bb != 0:
        bb = B                          # full-batch block is always layout-legal
    grid = (B // bb,)
    rows = weights.shape[0]

    x2 = x.reshape(B, T * d_in)         # contiguous reshape (metadata only)

    out = pl.pallas_call(
        functools.partial(_drqn_kernel, seq_len=T),
        out_shape=jax.ShapeDtypeStruct((B, 128), jnp.float32),
        grid=grid,
        in_specs=[
            pl.BlockSpec((bb, T * d_in), lambda b: (b, 0)),
            pl.BlockSpec((rows, 128), lambda b: (0, 0)),    # resident across grid
            pl.BlockSpec((bb, 2 * HIDDEN), lambda b: (b, 0)),
        ],
        out_specs=pl.BlockSpec((bb, 128), lambda b: (b, 0)),
        compiler_params=pltpu.CompilerParams(
            dimension_semantics=("parallel",)),   # v7x: batch tiles split over 2 TCs
    )(x2, weights, hc0)

    q = out[:, 2 * HIDDEN:2 * HIDDEN + num_outputs]
    hc_n = out[:, 0:2 * HIDDEN]
    return q, hc_n


def _reference_forward(x, params, h, c):
    """Pure-JAX reference mirroring the PyTorch forward for one environment."""
    h = h.reshape(1, HIDDEN)
    c = c.reshape(1, HIDDEN)
    out = jax.nn.relu(x @ params["fc1_w"].T + params["fc1_b"])     # (T, 16)
    for t in range(out.shape[0]):
        gates = (out[t:t + 1] @ params["w_ih"].T + params["b_ih"]
                 + h @ params["w_hh"].T + params["b_hh"])
        i, f, g, o = jnp.split(gates, 4, axis=-1)
        c = jax.nn.sigmoid(f) * c + jax.nn.sigmoid(i) * jnp.tanh(g)
        h = jax.nn.sigmoid(o) * jnp.tanh(c)
    q = jax.nn.relu(h @ params["fc2_w"].T + params["fc2_b"])
    return q[0], h[0], c[0]


if __name__ == "__main__":
    num_inputs, num_outputs = 8, 4
    B, T = 16, 1          # T == 1: the torch forward's views require seq == 1
    key = jax.random.PRNGKey(0)
    k_x1, k_x2, k_p = jax.random.split(key, 3)

    params = init_drqn_params(k_p, num_inputs, num_outputs)
    weights = pack_drqn_weights(params)   # packed once, outside the rollout loop

    x1 = jax.random.normal(k_x1, (B, T, num_inputs), jnp.float32)
    x2 = jax.random.normal(k_x2, (B, T, num_inputs), jnp.float32)

    # Step 1: fresh (zero) hidden state for all B environments.
    q1, hc1 = drqn_forward(x1, weights, num_outputs=num_outputs)
    jax.block_until_ready((q1, hc1))
    assert q1.shape == (B, num_outputs) and hc1.shape == (B, 2 * HIDDEN)
    zeros = jnp.zeros((HIDDEN,), jnp.float32)
    for b in range(B):
        q_r, h_r, c_r = _reference_forward(x1[b], params, zeros, zeros)
        assert jnp.allclose(q1[b], q_r, atol=1e-5)
        assert jnp.allclose(hc1[b, :HIDDEN], h_r, atol=1e-5)
        assert jnp.allclose(hc1[b, HIDDEN:], c_r, atol=1e-5)

    # Step 2: carried hidden state (exercises the packed-state path).
    q2, hc2 = drqn_forward(x2, weights, num_outputs=num_outputs, hc0=hc1)
    jax.block_until_ready((q2, hc2))
    for b in range(B):
        q_r, h_r, c_r = _reference_forward(
            x2[b], params, hc1[b, :HIDDEN], hc1[b, HIDDEN:])
        assert jnp.allclose(q2[b], q_r, atol=1e-5)
        assert jnp.allclose(hc2[b, :HIDDEN], h_r, atol=1e-5)
        assert jnp.allclose(hc2[b, HIDDEN:], c_r, atol=1e-5)

    print("KERNEL_OK")
</pallas_src>

<mosaic_0001>
module attributes {stable_mosaic.version = 11 : i64} {
  func.func @_drqn_kernel(%arg0: i32, %arg1: memref<8x8xf32, #tpu.memory_space<vmem>>, %arg2: memref<64x128xf32, #tpu.memory_space<vmem>>, %arg3: memref<8x32xf32, #tpu.memory_space<vmem>>, %arg4: memref<8x128xf32, #tpu.memory_space<vmem>>) attributes {dimension_semantics = [#tpu.dimension_semantics<parallel>], iteration_bounds = array<i64: 2>, scalar_prefetch = 0 : i64, scratch_operands = 0 : i64, tpu.core_type = #tpu.core_type<tc>, window_params = [{transform_indices = @transform_0, window_bounds = array<i64: 8, 8>}, {pipeline_mode = #tpu.pipeline_mode<synchronous>, transform_indices = @transform_1, window_bounds = array<i64: 64, 128>}, {transform_indices = @transform_2, window_bounds = array<i64: 8, 32>}, {transform_indices = @transform_3, window_bounds = array<i64: 8, 128>}]} {
    %c0 = arith.constant 0 : index
    %c0_0 = arith.constant 0 : index
    %0 = vector.load %arg2[%c0, %c0_0] : memref<64x128xf32, #tpu.memory_space<vmem>>, vector<8x16xf32>
    %c8 = arith.constant 8 : index
    %c0_1 = arith.constant 0 : index
    %1 = vector.load %arg2[%c8, %c0_1] : memref<64x128xf32, #tpu.memory_space<vmem>>, vector<16x64xf32>
    %c24 = arith.constant 24 : index
    %c0_2 = arith.constant 0 : index
    %2 = vector.load %arg2[%c24, %c0_2] : memref<64x128xf32, #tpu.memory_space<vmem>>, vector<16x64xf32>
    %c40 = arith.constant 40 : index
    %c0_3 = arith.constant 0 : index
    %3 = vector.load %arg2[%c40, %c0_3] : memref<64x128xf32, #tpu.memory_space<vmem>>, vector<16x96xf32>
    %c56 = arith.constant 56 : index
    %c0_4 = arith.constant 0 : index
    %4 = vector.load %arg2[%c56, %c0_4] : memref<64x128xf32, #tpu.memory_space<vmem>>, vector<1x16xf32>
    %c57 = arith.constant 57 : index
    %c0_5 = arith.constant 0 : index
    %5 = vector.load %arg2[%c57, %c0_5] : memref<64x128xf32, #tpu.memory_space<vmem>>, vector<1x64xf32>
    %c58 = arith.constant 58 : index
    %c0_6 = arith.constant 0 : index
    %6 = vector.load %arg2[%c58, %c0_6] : memref<64x128xf32, #tpu.memory_space<vmem>>, vector<1x96xf32>
    %c0_7 = arith.constant 0 : index
    %c0_8 = arith.constant 0 : index
    %7 = vector.load %arg1[%c0_7, %c0_8] : memref<8x8xf32, #tpu.memory_space<vmem>>, vector<8x8xf32>
    %c0_9 = arith.constant 0 : index
    %c0_10 = arith.constant 0 : index
    %8 = vector.load %arg3[%c0_9, %c0_10] : memref<8x32xf32, #tpu.memory_space<vmem>>, vector<8x16xf32>
    %c0_11 = arith.constant 0 : index
    %c16 = arith.constant 16 : index
    %9 = vector.load %arg3[%c0_11, %c16] : memref<8x32xf32, #tpu.memory_space<vmem>>, vector<8x16xf32>
    %cst = arith.constant dense<0.000000e+00> : vector<8x16xf32>
    %10 = tpu.matmul %7, %0, %cst {dimension_numbers = #tpu.dot_dimension_numbers<[1], [0], [0], [1], [0, 0, 1, 1], [], []>} : vector<8x8xf32>, vector<8x16xf32>, vector<8x16xf32> -> vector<8x16xf32>
    %11 = vector.broadcast %4 : vector<1x16xf32> to vector<8x16xf32>
    %12 = arith.addf %10, %11 : vector<8x16xf32>
    %cst_12 = arith.constant 0.000000e+00 : f32
    %13 = vector.broadcast %cst_12 : f32 to vector<8x16xf32>
    %14 = arith.maximumf %12, %13 : vector<8x16xf32>
    %cst_13 = arith.constant dense<0.000000e+00> : vector<8x64xf32>
    %15 = tpu.matmul %14, %1, %cst_13 {dimension_numbers = #tpu.dot_dimension_numbers<[1], [0], [0], [1], [0, 0, 1, 1], [], []>} : vector<8x16xf32>, vector<16x64xf32>, vector<8x64xf32> -> vector<8x64xf32>
    %16 = vector.broadcast %5 : vector<1x64xf32> to vector<8x64xf32>
    %17 = arith.addf %15, %16 : vector<8x64xf32>
    %cst_14 = arith.constant dense<0.000000e+00> : vector<8x64xf32>
    %18 = tpu.matmul %8, %2, %cst_14 {dimension_numbers = #tpu.dot_dimension_numbers<[1], [0], [0], [1], [0, 0, 1, 1], [], []>} : vector<8x16xf32>, vector<16x64xf32>, vector<8x64xf32> -> vector<8x64xf32>
    %19 = arith.addf %17, %18 : vector<8x64xf32>
    %20 = arith.negf %19 : vector<8x64xf32>
    %21 = math.exp %20 : vector<8x64xf32>
    %cst_15 = arith.constant 1.000000e+00 : f32
    %22 = vector.broadcast %cst_15 : f32 to vector<8x64xf32>
    %23 = arith.addf %22, %21 : vector<8x64xf32>
    %24 = arith.divf %22, %23 : vector<8x64xf32>
    %25 = math.tanh %19 : vector<8x64xf32>
    %26 = vector.extract_strided_slice %24 {offsets = [0, 0], sizes = [8, 16], strides = [1, 1]} : vector<8x64xf32> to vector<8x16xf32>
    %27 = vector.extract_strided_slice %24 {offsets = [0, 16], sizes = [8, 16], strides = [1, 1]} : vector<8x64xf32> to vector<8x16xf32>
    %28 = vector.extract_strided_slice %25 {offsets = [0, 32], sizes = [8, 16], strides = [1, 1]} : vector<8x64xf32> to vector<8x16xf32>
    %29 = vector.extract_strided_slice %24 {offsets = [0, 48], sizes = [8, 16], strides = [1, 1]} : vector<8x64xf32> to vector<8x16xf32>
    %30 = arith.mulf %27, %9 : vector<8x16xf32>
    %31 = arith.mulf %26, %28 : vector<8x16xf32>
    %32 = arith.addf %30, %31 : vector<8x16xf32>
    %33 = math.tanh %32 : vector<8x16xf32>
    %34 = arith.mulf %29, %33 : vector<8x16xf32>
    %cst_16 = arith.constant dense<0.000000e+00> : vector<8x96xf32>
    %35 = tpu.matmul %34, %3, %cst_16 {dimension_numbers = #tpu.dot_dimension_numbers<[1], [0], [0], [1], [0, 0, 1, 1], [], []>} : vector<8x16xf32>, vector<16x96xf32>, vector<8x96xf32> -> vector<8x96xf32>
    %36 = vector.broadcast %6 : vector<1x96xf32> to vector<8x96xf32>
    %37 = arith.addf %35, %36 : vector<8x96xf32>
    %cst_17 = arith.constant 0.000000e+00 : f32
    %38 = vector.broadcast %cst_17 : f32 to vector<8x96xf32>
    %39 = arith.maximumf %37, %38 : vector<8x96xf32>
    %40 = tpu.concatenate %34, %32, %39 in 1 : vector<8x16xf32>, vector<8x16xf32>, vector<8x96xf32> -> vector<8x128xf32>
    %c0_18 = arith.constant 0 : index
    %c0_19 = arith.constant 0 : index
    %41 = vector.load %arg4[%c0_18, %c0_19] : memref<8x128xf32, #tpu.memory_space<vmem>>, vector<8x128xf32>
    tpu.vector_store %arg4[%c0_18, %c0_19], %40 {strides = array<i32>} : memref<8x128xf32, #tpu.memory_space<vmem>>, vector<8x128xf32>,
    return
  }
  func.func @transform_0(%arg0: i32) -> (i32, i32) {
    %c0_i32 = arith.constant 0 : i32
    %c0_i32_0 = arith.constant 0 : i32
    return %arg0, %c0_i32 : i32, i32
  }
  func.func @transform_1(%arg0: i32) -> (i32, i32) {
    %c0_i32 = arith.constant 0 : i32
    %c0_i32_0 = arith.constant 0 : i32
    %c0_i32_1 = arith.constant 0 : i32
    return %c0_i32, %c0_i32_0 : i32, i32
  }
  func.func @transform_2(%arg0: i32) -> (i32, i32) {
    %c0_i32 = arith.constant 0 : i32
    %c0_i32_0 = arith.constant 0 : i32
    return %arg0, %c0_i32 : i32, i32
  }
  func.func @transform_3(%arg0: i32) -> (i32, i32) {
    %c0_i32 = arith.constant 0 : i32
    %c0_i32_0 = arith.constant 0 : i32
    return %arg0, %c0_i32 : i32, i32
  }
}

</mosaic_0001>

<bundles_post_ra>
// kernel: drqn_forward.1
= control target key start
LH: loop header
LB: loop body
LE: loop exit
PB: predicated region body
PF: predicated region fallthrough
CT: control target
= control target key end

     0   :  { %8 = vsyncpa [#allocation3], 0  ;;  %s806_s12 = smov 0   ;;  %s878_s0 = inlined_call_operand.vmem [shape: f32[16,8], index: 0, kind: input, shape index: {}]   ;;  %s879_s1 = inlined_call_operand.hbm [shape: f32[64,128], index: 1, kind: input, shape index: {}]   ;;  %s880_s2 = inlined_call_operand.vmem [shape: f32[16,32], index: 2, kind: input, shape index: {}]   ;;  %s881_s3 = inlined_call_operand.vmem [shape: f32[16,128], index: 3, kind: output, shape index: {}]  }
   0x1 LB: > { %s812_s13 = sadd.s32 4294967295, %s774_s12   ;;  %p633_p0 = scmp.ge.s32.totalorder %s774_s12, 1  ;;  %s774_s12 = sphi %s806_s12, %s14_s12  }
   0x2   : > { %p118_p1 = scmp.lt.s32.totalorder %s774_s12, 3  ;;  %s776_s14 = smov [#allocation2]  }
   0x3   : > { %s130_s15 = sshll.u32 %s776_s14, 4  ;;  %p882_p3 = scmp.eq.s32.totalorder %s812_s13, 0  ;;  %s131_s15 = int_to_ptr.vmem [resolvable:$true] %s130_s15 }
   0x4   : > { %p816_p2 = pnand %p633_p0, %p118_p1  ;;  %s736_s20 = scalar_lea.hbm %s879_s1, 1024 }
   0x5   : > { %p737_p6 = scmp.ne.s32.totalorder %s879_s1, %s736_s20  ;;  %p743_p10 = scmp.lt.u32.totalorder %s736_s20, %s879_s1 }
   0x6   : > { %s884_s16 = scalar_select %p816_p2, 1, 0 }
   0x7   : > { %p704_p4 = pneg %p816_p2 }
   0x9   : > { %p825_p5 = pnand %p882_p3, %p704_p4 }
   0xb   : > { %p738_p7 = pneg %p825_p5 }
   0xd   : > { %p739_p8 = pnand %p738_p7, %p737_p6 }
   0xf   : > { %p740_p9 = pneg %p739_p8 }
  0x11   : > { %p745_p11 = pnand %p743_p10, %p740_p9 }
  0x13   : > { %748 = shalt.err (!%p745_p11)
}
  0x14   : > { %s749_s25 = scalar_lea.vmem %s131_s15, 1024  ;;  %p757_p1 = scmp.lt.s32.totalorder %s131_s15, %s131_s15 }
  0x15   : > { %p750_p12 = scmp.ne.s32.totalorder %s131_s15, %s749_s25  ;;  %p758_p4 = scmp.lt.s32.totalorder %s749_s25, %s749_s25 }
  0x17   : > { %p752_p13 = pnand %p750_p12, %p738_p7  ;;  %p759_p3 = por %p758_p4, %p757_p1 }
  0x19   : > { %p753_p0 = pneg %p752_p13 }
  0x1b   : > { %p760_p2 = pnand %p759_p3, %p753_p0 }
  0x1d   : > { %763 = shalt.err (!%p760_p2)
}
  0x1e   : > { %s777_s26 = smov 128   ;;  %s778_s27 = smov 8  }
  0x1f   : > { %707 = dma.hbm_to_vmem [thread:$0]  (!%p825_p5), %s879_s1, 1024, %s131_s15, [#allocation3], %s777_s26, %s777_s26, %s778_s27  }
  0x20   : > { %p886_p6 = scmp.ne.s32.totalorder %s884_s16, 0 }
  0x21   : > { %p887_p8 = scmp.eq.s32.totalorder (!%p886_p6), %s812_s13, 0 }
  0x22   : > { %160 = sbr.rel (%p886_p6) target bundleno = 1307 (0x51b), region = 32 }
  0x29   : > { %769 = dma.done.wait (%p887_p8), [#allocation3], 1024   ;;  %p888_p7 = pmov %p887_p8 }
  0x2a   : > { %p186_p2 = scmp.lt.s32.totalorder %s812_s13, 1  ;;  %v779_v0 = vmov 0.0   ;;  %vm780_vm0 = vmmov 0   ;;  %vm214_vm1 = vcmask 64512   ;;  %v198_v1 = vld [vmem:[#allocation2] sm:$0xff]  ;;  %v199_v3 = vld [vmem:[#allocation2 + $0x8] sm:$0xff] }
  0x2b   : > { %771 = vsyncadd (%p888_p7), [#allocation3], 4294966272  ;;  %662 = vmatprep.subr.mxu0 %v779_v0  ;;  %664 = vmatprep.mubr.msk.f32.mxu0 %vm780_vm0, %v779_v0  ;;  %v200_v4 = vld [vmem:[#allocation2 + $0x10] sm:$0xff]  ;;  %v781_v6 = vmov 0.0|0.0   ;;  %v641_v7 = vld [vmem:[#allocation2 + $0x38] ss:$0 sm:$0xff] }
  0x2c   : > { %s890_s13 = smov (!%p186_p2, %s812_s13), 1  ;;  %671 = vmatprep.mubr.msk.f32.mxu1 %vm780_vm0, %v779_v0  ;;  %663 = vmatpush3.msra.mxu0 %v198_v1  ;;  %v689_v5 = vpack.c.bf16 %v200_v4, %v199_v3  ;;  %v201_v8 = vld [vmem:[#allocation2 + $0x18] sm:$0xff]  ;;  %v202_v9 = vld [vmem:[#allocation2 + $0x20] sm:$0xff]  ;;  %vm293_vm2 = vcmask 130048   ;;  %s782_s10 = smov 96   ;;  %v203_v30 = vld [vmem:[#allocation2 + $0x28] sm:$0xff] }
  0x2d   : > { %s855_s30 = sshll.u32 %s890_s13, 3  ;;  %688 = vmatprep.subr.bf16.mxu1 %v781_v6  ;;  %694 = vmatprep.subr.bf16.mxu0 %v781_v6  ;;  %v692_v13 = vpack.c.bf16 %v202_v9, %v201_v8  ;;  %v643_v16 = vld [vmem:[#allocation2 + $0x39] ss:$0 sm:$0xff]  ;;  %s783_s11 = smov 16   ;;  %v204_v31 = vld [vmem:[#allocation2 + $0x30] sm:$0xff]  ;;  %vm551_vm3 = vcmask 261120  }
  0x2e   : > { %s189_s6 = scalar_lea.vmem %s878_s0, %s855_s30  ;;  %690 = vmatpush3.bf16.msra.mxu1 %v689_v5  ;;  %s193_s9 = scalar_lea.vmem %s880_s2, %s855_s30  ;;  %v695_v32 = vpack.c.bf16 %v204_v31, %v203_v30  ;;  %v647_v37 = vld [vmem:[#allocation2 + $0x3a] ss:$0 sm:$0xff] }
  0x2f   : > { %v208_v2 = vld [vmem:[%s189_s6] sm:$0xff]  ;;  %691 = vmatprep.subr.bf16.mxu1 %v781_v6  ;;  %s784_s13 = smov 32   ;;  %s785_s14 = smov 80  }
  0x30   : > { %665 = vmatmul.mubr.msk.f32.vlgmr.msra.gmra.mrb[0].mxu0 %vm214_vm1, %v208_v2  ;;  %v209_v15 = vld [vmem:[%s193_s9] sm:$0xff]  ;;  %s197_s17 = scalar_lea.vmem %s881_s3, %s855_s30 }
  0x31   : > { %685 = vmatprep.mubr.msk.f32.mxu0 %vm780_vm0, %v779_v0  ;;  %696 = vmatpush3.bf16.msra.mxu0 %v695_v32 }
 0x103   : > { %v284_v10 = vpop.f32.mrb[0].mxu0 }
 0x104   : > { %v285_v11 = vadd.f32 %v641_v7, %v284_v10  ;;  %v666_v12 = vpop.f32.mrb[1].mxu0 }
 0x106   : > { %v288_v14 = vmax.f32 %v285_v11, 0.0 }
 0x108   : > { %672 = vmatmul.mubr.msk.f32.vlgmr.msra.gmra.mrb[0].mxu1 %vm293_vm2, %v288_v14 }
 0x109   : > { %693 = vmatpush3.bf16.msra.mxu1 %v692_v13  ;;  %678 = vmatprep.mubr.msk.f32.mxu1 %vm780_vm0, %v779_v0 }
 0x110   : > { %679 = vmatmul.mubr.msk.f32.vlgmr.msra.gmra.mrb[0].mxu1 %vm293_vm2, %v209_v15 }
 0x1e3   : > { %v436_v17 = vpop.f32.mrb[0].mxu1 }
 0x1e4   : > { %v697_v18 = vadd.f32 %v643_v16, %v436_v17  ;;  %v680_v19 = vpop.f32.mrb[1].mxu1 }
 0x1e6   : > { %728 = vtanh.f32 %v697_v18  ;;  %v646_v21 = vmul.f32 -1.442695, %v697_v18 }
 0x1e8   : > { %730 = vpow2.f32 %v646_v21 }
 0x1f0   : > { %v729_v20 = vpop.eup %728 }
 0x1f1   : > { %450 = vrot.lane.b32.xlu0 %v729_v20, %s782_s10 }
 0x1f2   : > { %v731_v22 = vpop.eup %730 }
 0x1f3   : > { %v444_v23 = vadd.f32 1.0, %v731_v22 }
 0x1f5   : > { %732 = vrcp.f32 %v444_v23 }
 0x1ff   : > { %v733_v24 = vpop.eup %732 }
 0x200   : > { %v448_v27 = vmul.f32 %v733_v24, %v209_v15 }
 0x263   : > { %v451_v25 = vpop.permute.xlu0 %450 }
 0x264   : > { %v453_v26 = vmul.f32 %v733_v24, %v451_v25 }
 0x266   : > { %455 = vrot.lane.b32.xlu0 %v453_v26, %s783_s11 }
 0x2d8   : > { %v456_v28 = vpop.permute.xlu0 %455 }
 0x2d9   : > { %v458_v29 = vadd.f32 %v456_v28, %v448_v27 }
 0x2db   : > { %734 = vtanh.f32 %v458_v29 }
 0x2e5   : > { %v735_v33 = vpop.eup %734 }
 0x2e6   : > { %461 = vrot.lane.b32.xlu1 %v735_v33, %s784_s13 }
 0x358   : > { %v462_v34 = vpop.permute.xlu1 %461 }
 0x359   : > { %v464_v35 = vmul.f32 %v733_v24, %v462_v34 }
 0x35b   : > { %470 = vrot.lane.b32.xlu1 %v464_v35, %s785_s14 }
 0x3cd   : > { %v471_v36 = vpop.permute.xlu1 %470 }
 0x3ce   : > { %686 = vmatmul.mubr.msk.f32.vlgmr.msra.gmra.mrb[2].mxu0 %vm293_vm2, %v471_v36  ;;  %v550_v42 = vsel %vm293_vm2, %v471_v36, %v458_v29 }
 0x4a1   : > { %v540_v38 = vpop.f32.mrb[2].mxu0 }
 0x4a2   : > { %v541_v39 = vadd.f32 %v647_v37, %v540_v38  ;;  %v687_v40 = vpop.f32.mrb[3].mxu0 }
 0x4a4   : > { %v544_v41 = vmax.f32 %v541_v39, 0.0 }
 0x4a6   : > { %547 = vrot.lane.b32.xlu0 %v544_v41, %s784_s13 }
 0x518   : > { %v548_v43 = vpop.permute.xlu0 %547 }
 0x519   : > { %v552_v44 = vsel %vm551_vm3, %v550_v42, %v548_v43 }
 0x51a   : > { %553 = vst [vmem:[%s197_s17] sm:$0xff] %v552_v44 }
 0x51b PF: > { %s14_s12 = sadd.s32 1, %s774_s12  }
 0x51c   : > { %p11_p3 = scmp.ge.s32.totalorder %s14_s12, 4  }
 0x51e   :  { %13 = sbr.rel (!%p11_p3) target bundleno = 1 (0x1), region = 70 }
 0x525   :  { %573 = vsyncpa [#allocation3], 1 }
 0x526   :  { %575 = vsyncpa [#allocation3 + $0x1], 1 }

</bundles_post_ra>
